<compile_context>
chip_gen: v6e
topology: v6e:2x2x1
jax: 0.10.0
libtpu: 0.0.40
codegen_flags: <defaults>
</compile_context>

<pallas_src>
import functools

import jax
import jax.numpy as jnp
from jax import lax
from jax.experimental import pallas as pl
from jax.experimental.pallas import tpu as pltpu


# ----------------------------- Pallas kernel --------------------------------
def _fused_convblock_kernel(x_ref, w1_ref, b1_ref, w2_ref, b2_ref, o_ref):
    """Fused (conv3x3 + folded-BN + ReLU) x 2 for a tile of B_t images.

    x_ref  : (B_t, H, W*Cin)      bf16 input rows (NHWC flattened per row)
    w1_ref : (3*W*Cin,  W*Cout)   bf16 kh-fused block-Toeplitz weights (BN folded)
    b1_ref : (1, W*Cout)          f32  folded bias, tiled along W
    w2_ref : (3*W*Cout, W*Cout)   bf16 kh-fused block-Toeplitz weights (BN folded)
    b2_ref : (1, W*Cout)          f32  folded bias, tiled along W
    o_ref  : (B_t, H, W*Cout)     f32  output rows
    """
    bt, H, _ = x_ref.shape
    WC_out = o_ref.shape[2]

    def conv_bn_relu(x, w_ref, b_ref):
        # x: (bt, H, WC) bf16.  Build the kh-fused slab (bt, H, 3*WC):
        #   lanes [0,   WC)  = row h-1  (kh=0; zero above the top row)
        #   lanes [WC, 2WC)  = row h    (kh=1)
        #   lanes [2WC,3WC)  = row h+1  (kh=2; zero below the bottom row)
        # Per-image halos are implicit because the shift is along axis 1 only.
        WC = x.shape[2]
        zrow = jnp.zeros((bt, 1, WC), x.dtype)
        up = jnp.concatenate([zrow, x[:, :H - 1, :]], axis=1)
        dn = jnp.concatenate([x[:, 1:, :], zrow], axis=1)
        slab = jnp.concatenate([up, x, dn], axis=2).reshape(bt * H, 3 * WC)
        # One MXU matmul per stage: M = bt*H, K = 3*WC, N = W*Cout.
        acc = jnp.dot(slab, w_ref[...], preferred_element_type=jnp.float32)
        return jnp.maximum(acc + b_ref[...], 0.0)          # (bt*H, WC_out) f32

    mid = conv_bn_relu(x_ref[...], w1_ref, b1_ref)          # stage 1
    mid = mid.astype(jnp.bfloat16).reshape(bt, H, WC_out)   # stays on-chip
    out = conv_bn_relu(mid, w2_ref, b2_ref)                 # stage 2
    o_ref[...] = out.reshape(bt, H, WC_out).astype(o_ref.dtype)


# ----------------------------- wrapper helpers -------------------------------
def _fold_bn_into_conv(w, b, gamma, beta, mu, var, eps=1e-5):
    """Fold inference-mode BN into conv weights/bias (in f32).

    w: (3,3,Cin,Cout) HWIO, b/gamma/beta/mu/var: (Cout,).
    Returns w' = w*scale (per Cout) and b' = (b - mu)*scale + beta.
    """
    scale = gamma / jnp.sqrt(var + eps)
    w_f = (w.astype(jnp.float32) * scale[None, None, None, :])
    b_f = ((b - mu) * scale + beta).astype(jnp.float32)
    return w_f, b_f


def _fused_toeplitz(w_f32, width):
    """(3,3,Cin,Cout) HWIO weights -> kh-fused block-Toeplitz matrix (bf16).

    Output: (3*width*Cin, width*Cout) with
      T[(kh*width + wi)*Cin + ci, wo*Cout + co] = w[kh, wi-wo+1, ci, co]
                                                   if 0 <= wi-wo+1 < 3 else 0,
    i.e. the W-axis SAME padding is absorbed into the matrix and the kh axis is
    stacked along K so each stage is a single matmul.
    """
    KH, KW, Cin, Cout = w_f32.shape
    wi = jnp.arange(width)[:, None]            # input column
    wo = jnp.arange(width)[None, :]            # output column
    kw = wi - wo + (KW // 2)                   # (width, width)
    valid = (kw >= 0) & (kw < KW)
    kw_c = jnp.clip(kw, 0, KW - 1)
    t = w_f32[:, kw_c, :, :]                   # (KH, width, width, Cin, Cout)
    t = jnp.where(valid[None, :, :, None, None], t, 0.0)
    t = jnp.transpose(t, (0, 1, 3, 2, 4))      # (KH, wi, Cin, wo, Cout)
    t = t.reshape(KH * width * Cin, width * Cout)
    return t.astype(jnp.bfloat16)


def _pick_batch_tile(N, H):
    """Pick B_t (divisor of N): prefer M = B_t*H in [128, 512] with grid >= 2
    (megacore/v7x), then M >= 128, then any grid >= 2, then smallest tile."""
    divisors = [d for d in range(1, N + 1) if N % d == 0]

    def score(bt):
        m = bt * H
        grid = N // bt
        return (m >= 128 and grid >= 2, m >= 128, grid >= 2, min(m, 512), -bt)

    return max(divisors, key=score)


def conv_block_rows(x_rows, params, eps=1e-5):
    """ConvBlock on row-slab activations: (N, H, W*Cin) -> (N, H, W*Cout) f32."""
    N, H, WCin = x_rows.shape
    Cin = params["w1"].shape[2]
    Cout = params["w1"].shape[3]
    W = WCin // Cin
    WCout = W * Cout

    # Fold BN (inference mode, f32), build kh-fused Toeplitz weights (bf16) and
    # W-tiled biases once in plain JAX (weights are tiny).
    w1f, b1f = _fold_bn_into_conv(params["w1"], params["b1"], params["g1"],
                                  params["beta1"], params["mu1"],
                                  params["var1"], eps)
    w2f, b2f = _fold_bn_into_conv(params["w2"], params["b2"], params["g2"],
                                  params["beta2"], params["mu2"],
                                  params["var2"], eps)
    wt1 = _fused_toeplitz(w1f, W)                  # (3*W*Cin,  W*Cout) bf16
    wt2 = _fused_toeplitz(w2f, W)                  # (3*W*Cout, W*Cout) bf16
    b1t = jnp.tile(b1f, W).reshape(1, WCout)       # f32
    b2t = jnp.tile(b2f, W).reshape(1, WCout)       # f32

    x_bf16 = x_rows.astype(jnp.bfloat16)

    B_t = _pick_batch_tile(N, H)
    grid = (N // B_t,)

    return pl.pallas_call(
        _fused_convblock_kernel,
        out_shape=jax.ShapeDtypeStruct((N, H, WCout), jnp.float32),
        grid_spec=pltpu.PrefetchScalarGridSpec(
            num_scalar_prefetch=0,
            grid=grid,
            in_specs=[
                pl.BlockSpec((B_t, H, WCin), lambda n: (n, 0, 0)),
                pl.BlockSpec((3 * WCin, WCout), lambda n: (0, 0)),
                pl.BlockSpec((1, WCout), lambda n: (0, 0)),
                pl.BlockSpec((3 * WCout, WCout), lambda n: (0, 0)),
                pl.BlockSpec((1, WCout), lambda n: (0, 0)),
            ],
            out_specs=pl.BlockSpec((B_t, H, WCout), lambda n: (n, 0, 0)),
        ),
        compiler_params=pltpu.CompilerParams(
            dimension_semantics=("parallel",),
            vmem_limit_bytes=48 * 1024 * 1024,
        ),
    )(x_bf16, wt1, b1t, wt2, b2t)


def conv_block_forward(x_nchw, params, eps=1e-5):
    """NCHW adapter matching the PyTorch module: (N,Cin,H,W) -> (N,Cout,H,W).

    For a full UNet, keep activations in the (N, H, W*C) row-slab (NHWC) layout
    between layers and call conv_block_rows directly; the two transposes below
    each cost a full HBM read+write of the activation tensor.
    """
    N, Cin, H, W = x_nchw.shape
    Cout = params["w1"].shape[-1]
    x_rows = jnp.transpose(x_nchw, (0, 2, 3, 1)).reshape(N, H, W * Cin)
    out_rows = conv_block_rows(x_rows, params, eps)
    return jnp.transpose(out_rows.reshape(N, H, W, Cout), (0, 3, 1, 2))


# ----------------------------- reference (pure JAX) --------------------------
def _ref_conv_block(x_nchw, params):
    def conv(x, w_hwio, b):
        w_oihw = jnp.transpose(w_hwio, (3, 2, 0, 1))
        y = lax.conv_general_dilated(
            x, w_oihw, window_strides=(1, 1), padding="SAME",
            dimension_numbers=("NCHW", "OIHW", "NCHW"))
        return y + b.reshape(1, -1, 1, 1)

    def bn_relu(x, g, beta, mu, var, eps=1e-5):
        inv = g / jnp.sqrt(var + eps)
        y = (x - mu.reshape(1, -1, 1, 1)) * inv.reshape(1, -1, 1, 1) \
            + beta.reshape(1, -1, 1, 1)
        return jnp.maximum(y, 0.0)

    x = bn_relu(conv(x_nchw, params["w1"], params["b1"]),
                params["g1"], params["beta1"], params["mu1"], params["var1"])
    x = bn_relu(conv(x, params["w2"], params["b2"]),
                params["g2"], params["beta2"], params["mu2"], params["var2"])
    return x


if __name__ == "__main__":
    key = jax.random.PRNGKey(0)
    ks = jax.random.split(key, 12)

    N, Cin, H, W = 2, 4, 16, 16
    Cout = 8

    x = jax.random.normal(ks[0], (N, Cin, H, W), dtype=jnp.float32)

    params = {
        # conv1: Cin -> Cout, weights stored as (kh, kw, Cin, Cout)
        "w1": 0.1 * jax.random.normal(ks[1], (3, 3, Cin, Cout), jnp.float32),
        "b1": 0.05 * jax.random.normal(ks[2], (Cout,), jnp.float32),
        "g1": 1.0 + 0.1 * jax.random.normal(ks[3], (Cout,), jnp.float32),
        "beta1": 0.1 * jax.random.normal(ks[4], (Cout,), jnp.float32),
        "mu1": 0.1 * jax.random.normal(ks[5], (Cout,), jnp.float32),
        "var1": 1.0 + 0.1 * jax.random.uniform(ks[6], (Cout,), jnp.float32),
        # conv2: Cout -> Cout
        "w2": 0.1 * jax.random.normal(ks[7], (3, 3, Cout, Cout), jnp.float32),
        "b2": 0.05 * jax.random.normal(ks[8], (Cout,), jnp.float32),
        "g2": 1.0 + 0.1 * jax.random.normal(ks[9], (Cout,), jnp.float32),
        "beta2": 0.1 * jax.random.normal(ks[10], (Cout,), jnp.float32),
        "mu2": 0.1 * jax.random.normal(ks[11], (Cout,), jnp.float32),
        "var2": jnp.linspace(0.9, 1.3, Cout, dtype=jnp.float32),
    }

    fwd = jax.jit(functools.partial(conv_block_forward, params=params))
    out = jax.block_until_ready(fwd(x))

    ref = _ref_conv_block(x, params)
    assert out.shape == (N, Cout, H, W)
    # bf16 activations/weights (f32 accumulation) -> loosened tolerance.
    assert jnp.allclose(out, ref, atol=5e-2, rtol=5e-2), "mismatch vs reference"

    print("KERNEL_OK")
</pallas_src>

<mosaic_0001>
module attributes {stable_mosaic.version = 11 : i64} {
  func.func @_fused_convblock_kernel(%arg0: i32, %arg1: memref<1x16x64xbf16, #tpu.memory_space<vmem>>, %arg2: memref<192x128xbf16, #tpu.memory_space<vmem>>, %arg3: memref<1x128xf32, #tpu.memory_space<vmem>>, %arg4: memref<384x128xbf16, #tpu.memory_space<vmem>>, %arg5: memref<1x128xf32, #tpu.memory_space<vmem>>, %arg6: memref<1x16x128xf32, #tpu.memory_space<vmem>>) attributes {dimension_semantics = [#tpu.dimension_semantics<parallel>], iteration_bounds = array<i64: 2>, scalar_prefetch = 0 : i64, scratch_operands = 0 : i64, tpu.core_type = #tpu.core_type<tc>, window_params = [{transform_indices = @transform_0, window_bounds = array<i64: 1, 16, 64>}, {pipeline_mode = #tpu.pipeline_mode<synchronous>, transform_indices = @transform_1, window_bounds = array<i64: 192, 128>}, {pipeline_mode = #tpu.pipeline_mode<synchronous>, transform_indices = @transform_2, window_bounds = array<i64: 1, 128>}, {pipeline_mode = #tpu.pipeline_mode<synchronous>, transform_indices = @transform_3, window_bounds = array<i64: 384, 128>}, {pipeline_mode = #tpu.pipeline_mode<synchronous>, transform_indices = @transform_4, window_bounds = array<i64: 1, 128>}, {transform_indices = @transform_5, window_bounds = array<i64: 1, 16, 128>}]} {
    %c0 = arith.constant 0 : index
    %c0_0 = arith.constant 0 : index
    %c0_1 = arith.constant 0 : index
    %0 = vector.load %arg1[%c0, %c0_0, %c0_1] : memref<1x16x64xbf16, #tpu.memory_space<vmem>>, vector<1x16x64xbf16>
    %cst = arith.constant 0.000000e+00 : bf16
    %1 = vector.broadcast %cst : bf16 to vector<1x1x64xbf16>
    %2 = vector.extract_strided_slice %0 {offsets = [0, 0, 0], sizes = [1, 15, 64], strides = [1, 1, 1]} : vector<1x16x64xbf16> to vector<1x15x64xbf16>
    %3 = tpu.concatenate %1, %2 in 1 : vector<1x1x64xbf16>, vector<1x15x64xbf16> -> vector<1x16x64xbf16>
    %4 = vector.extract_strided_slice %0 {offsets = [0, 1, 0], sizes = [1, 15, 64], strides = [1, 1, 1]} : vector<1x16x64xbf16> to vector<1x15x64xbf16>
    %5 = tpu.concatenate %4, %1 in 1 : vector<1x15x64xbf16>, vector<1x1x64xbf16> -> vector<1x16x64xbf16>
    %6 = tpu.concatenate %3, %0, %5 in 2 : vector<1x16x64xbf16>, vector<1x16x64xbf16>, vector<1x16x64xbf16> -> vector<1x16x192xbf16>
    %7 = vector.shape_cast %6 : vector<1x16x192xbf16> to vector<16x192xbf16>
    %c0_2 = arith.constant 0 : index
    %c0_3 = arith.constant 0 : index
    %8 = vector.load %arg2[%c0_2, %c0_3] : memref<192x128xbf16, #tpu.memory_space<vmem>>, vector<192x128xbf16>
    %cst_4 = arith.constant dense<0.000000e+00> : vector<16x128xf32>
    %9 = tpu.matmul %7, %8, %cst_4 {dimension_numbers = #tpu.dot_dimension_numbers<[1], [0], [0], [1], [0, 0, 1, 1], [], []>} : vector<16x192xbf16>, vector<192x128xbf16>, vector<16x128xf32> -> vector<16x128xf32>
    %c0_5 = arith.constant 0 : index
    %c0_6 = arith.constant 0 : index
    %10 = vector.load %arg3[%c0_5, %c0_6] : memref<1x128xf32, #tpu.memory_space<vmem>>, vector<1x128xf32>
    %11 = vector.broadcast %10 : vector<1x128xf32> to vector<16x128xf32>
    %12 = arith.addf %9, %11 : vector<16x128xf32>
    %cst_7 = arith.constant 0.000000e+00 : f32
    %13 = vector.broadcast %cst_7 : f32 to vector<16x128xf32>
    %14 = arith.maximumf %12, %13 : vector<16x128xf32>
    %15 = arith.truncf %14 : vector<16x128xf32> to vector<16x128xbf16>
    %16 = vector.shape_cast %15 : vector<16x128xbf16> to vector<1x16x128xbf16>
    %cst_8 = arith.constant 0.000000e+00 : bf16
    %17 = vector.broadcast %cst_8 : bf16 to vector<1x1x128xbf16>
    %18 = vector.extract_strided_slice %16 {offsets = [0, 0, 0], sizes = [1, 15, 128], strides = [1, 1, 1]} : vector<1x16x128xbf16> to vector<1x15x128xbf16>
    %19 = tpu.concatenate %17, %18 in 1 : vector<1x1x128xbf16>, vector<1x15x128xbf16> -> vector<1x16x128xbf16>
    %20 = vector.extract_strided_slice %16 {offsets = [0, 1, 0], sizes = [1, 15, 128], strides = [1, 1, 1]} : vector<1x16x128xbf16> to vector<1x15x128xbf16>
    %21 = tpu.concatenate %20, %17 in 1 : vector<1x15x128xbf16>, vector<1x1x128xbf16> -> vector<1x16x128xbf16>
    %22 = tpu.concatenate %19, %16, %21 in 2 : vector<1x16x128xbf16>, vector<1x16x128xbf16>, vector<1x16x128xbf16> -> vector<1x16x384xbf16>
    %23 = vector.shape_cast %22 : vector<1x16x384xbf16> to vector<16x384xbf16>
    %c0_9 = arith.constant 0 : index
    %c0_10 = arith.constant 0 : index
    %24 = vector.load %arg4[%c0_9, %c0_10] : memref<384x128xbf16, #tpu.memory_space<vmem>>, vector<384x128xbf16>
    %cst_11 = arith.constant dense<0.000000e+00> : vector<16x128xf32>
    %25 = tpu.matmul %23, %24, %cst_11 {dimension_numbers = #tpu.dot_dimension_numbers<[1], [0], [0], [1], [0, 0, 1, 1], [], []>} : vector<16x384xbf16>, vector<384x128xbf16>, vector<16x128xf32> -> vector<16x128xf32>
    %c0_12 = arith.constant 0 : index
    %c0_13 = arith.constant 0 : index
    %26 = vector.load %arg5[%c0_12, %c0_13] : memref<1x128xf32, #tpu.memory_space<vmem>>, vector<1x128xf32>
    %27 = vector.broadcast %26 : vector<1x128xf32> to vector<16x128xf32>
    %28 = arith.addf %25, %27 : vector<16x128xf32>
    %cst_14 = arith.constant 0.000000e+00 : f32
    %29 = vector.broadcast %cst_14 : f32 to vector<16x128xf32>
    %30 = arith.maximumf %28, %29 : vector<16x128xf32>
    %31 = vector.shape_cast %30 : vector<16x128xf32> to vector<1x16x128xf32>
    %c0_15 = arith.constant 0 : index
    %c0_16 = arith.constant 0 : index
    %c0_17 = arith.constant 0 : index
    %32 = vector.load %arg6[%c0_15, %c0_16, %c0_17] : memref<1x16x128xf32, #tpu.memory_space<vmem>>, vector<1x16x128xf32>
    tpu.vector_store %arg6[%c0_15, %c0_16, %c0_17], %31 {strides = array<i32>} : memref<1x16x128xf32, #tpu.memory_space<vmem>>, vector<1x16x128xf32>,
    return
  }
  func.func @transform_0(%arg0: i32) -> (i32, i32, i32) {
    %c0_i32 = arith.constant 0 : i32
    %c0_i32_0 = arith.constant 0 : i32
    %c0_i32_1 = arith.constant 0 : i32
    return %arg0, %c0_i32, %c0_i32_0 : i32, i32, i32
  }
  func.func @transform_1(%arg0: i32) -> (i32, i32) {
    %c0_i32 = arith.constant 0 : i32
    %c0_i32_0 = arith.constant 0 : i32
    %c0_i32_1 = arith.constant 0 : i32
    return %c0_i32, %c0_i32_0 : i32, i32
  }
  func.func @transform_2(%arg0: i32) -> (i32, i32) {
    %c0_i32 = arith.constant 0 : i32
    %c0_i32_0 = arith.constant 0 : i32
    %c0_i32_1 = arith.constant 0 : i32
    return %c0_i32, %c0_i32_0 : i32, i32
  }
  func.func @transform_3(%arg0: i32) -> (i32, i32) {
    %c0_i32 = arith.constant 0 : i32
    %c0_i32_0 = arith.constant 0 : i32
    %c0_i32_1 = arith.constant 0 : i32
    return %c0_i32, %c0_i32_0 : i32, i32
  }
  func.func @transform_4(%arg0: i32) -> (i32, i32) {
    %c0_i32 = arith.constant 0 : i32
    %c0_i32_0 = arith.constant 0 : i32
    %c0_i32_1 = arith.constant 0 : i32
    return %c0_i32, %c0_i32_0 : i32, i32
  }
  func.func @transform_5(%arg0: i32) -> (i32, i32, i32) {
    %c0_i32 = arith.constant 0 : i32
    %c0_i32_0 = arith.constant 0 : i32
    %c0_i32_1 = arith.constant 0 : i32
    return %arg0, %c0_i32, %c0_i32_0 : i32, i32, i32
  }
}

</mosaic_0001>

<bundles_post_ra>
// kernel: tile.10
= control target key start
LH: loop header
LB: loop body
LE: loop exit
PB: predicated region body
PF: predicated region fallthrough
CT: control target
= control target key end

     0   :  { %s28_s0 = inlined_call_operand.vmem [shape: f32[8], index: 0, kind: input, shape index: {}]   ;;  %s29_s1 = inlined_call_operand.vmem [shape: f32[16,8], index: 1, kind: output, shape index: {}]  }
   0x1   :  { %v4_v0 = vld [vmem:[%s28_s0] ss:$0 sm:$0xff] }
   0x2   :  { %5 = vst [vmem:[%s29_s1] sm:$0xff] %v4_v0  ;;  %8 = vst [vmem:[%s29_s1 + $0x8] sm:$0xff] %v4_v0 }

// kernel: tile.11
= control target key start
LH: loop header
LB: loop body
LE: loop exit
PB: predicated region body
PF: predicated region fallthrough
CT: control target
= control target key end

     0   :  { %s133_s10 = smov 120   ;;  %s134_s11 = smov 104   ;;  %vm3_vm0 = vcmask 64512   ;;  %vm9_vm1 = vcmask 1048512   ;;  %vm15_vm2 = vcmask 982912   ;;  %vm21_vm3 = vcmask 917312   ;;  %s209_s0 = inlined_call_operand.vmem [shape: f32[16,8], index: 0, kind: input, shape index: {}]   ;;  %s210_s1 = inlined_call_operand.vmem [shape: f32[1,128], index: 1, kind: output, shape index: {}]  }
   0x1   :  { %v103_v0 = vld [vmem:[%s209_s0 + $0xf] sm:$0x1]   ;;  %v105_v1 = vld [vmem:[%s209_s0 + $0xd] sm:$0x1]   ;;  %v104_v2 = vld [vmem:[%s209_s0 + $0xe] sm:$0x1]  }
   0x2   :  { %7 = vrot.lane.b32.xlu0 %v103_v0, %s133_s10  ;;  %19 = vrot.lane.b32.xlu1 %v105_v1, %s134_s11  ;;  %v106_v3 = vld [vmem:[%s209_s0 + $0xc] sm:$0x1]   ;;  %s135_s16 = smov 112   ;;  %s136_s17 = smov 96   ;;  %v107_v4 = vld [vmem:[%s209_s0 + $0xb] sm:$0x1]  }
   0x3   :  { %v108_v5 = vld [vmem:[%s209_s0 + $0xa] sm:$0x1]   ;;  %v2_v6 = vld [vmem:[%s209_s0] sm:$0x1]   ;;  %s137_s24 = smov 88   ;;  %s138_s25 = smov 80  }
   0x4   :  { %4 = vst.msk [vmem:[#allocation0] sm:$0x1] %vm3_vm0, %v2_v6   ;;  %v109_v7 = vld [vmem:[%s209_s0 + $0x9] sm:$0x1]   ;;  %v110_v8 = vld [vmem:[%s209_s0 + $0x8] sm:$0x1]  }
   0x5   :  { %s139_s30 = smov 72   ;;  %s140_s2 = smov 64   ;;  %v111_v9 = vld [vmem:[%s209_s0 + $0x7] sm:$0x1]   ;;  %v112_v10 = vld [vmem:[%s209_s0 + $0x6] sm:$0x1]  }
   0x6   :  { %13 = vrot.lane.b32.xlu0 %v104_v2, %s135_s16  ;;  %25 = vrot.lane.b32.xlu1 %v106_v3, %s136_s17  ;;  %s141_s7 = smov 56   ;;  %s142_s8 = smov 48   ;;  %v113_v11 = vld [vmem:[%s209_s0 + $0x5] sm:$0x1]   ;;  %v114_v12 = vld [vmem:[%s209_s0 + $0x4] sm:$0x1]  }
   0x7   :  { %s143_s13 = smov 40   ;;  %s144_s14 = smov 32   ;;  %v115_v13 = vld [vmem:[%s209_s0 + $0x3] sm:$0x1]   ;;  %v116_v14 = vld [vmem:[%s209_s0 + $0x2] sm:$0x1]  }
   0x8   :  { %s145_s19 = smov 24   ;;  %s146_s20 = smov 16   ;;  %v117_v15 = vld [vmem:[%s209_s0 + $0x1] sm:$0x1]   ;;  %vm27_vm4 = vcmask 851712   ;;  %vm33_vm5 = vcmask 786112  }
   0x9   :  { %s147_s0 = smov 8   ;;  %vm39_vm6 = vcmask 720512   ;;  %vm45_vm7 = vcmask 654912   ;;  %vm51_vm8 = vcmask 589312   ;;  %vm57_vm9 = vcmask 523712  }
   0xa   :  { %31 = vrot.lane.b32.xlu0 %v107_v4, %s137_s24  ;;  %37 = vrot.lane.b32.xlu1 %v108_v5, %s138_s25  ;;  %vm63_vm10 = vcmask 458112   ;;  %vm69_vm11 = vcmask 392512   ;;  %vm75_vm12 = vcmask 326912   ;;  %vm81_vm13 = vcmask 261312  }
   0xb   :  { %vm87_vm14 = vcmask 195712   ;;  %vm93_vm15 = vcmask 130112  }
   0xe   :  { %43 = vrot.lane.b32.xlu0 %v109_v7, %s139_s30  ;;  %49 = vrot.lane.b32.xlu1 %v110_v8, %s140_s2 }
  0x12   :  { %55 = vrot.lane.b32.xlu0 %v111_v9, %s141_s7  ;;  %61 = vrot.lane.b32.xlu1 %v112_v10, %s142_s8 }
  0x16   :  { %67 = vrot.lane.b32.xlu0 %v113_v11, %s143_s13  ;;  %73 = vrot.lane.b32.xlu1 %v114_v12, %s144_s14 }
  0x1a   :  { %79 = vrot.lane.b32.xlu0 %v115_v13, %s145_s19  ;;  %85 = vrot.lane.b32.xlu1 %v116_v14, %s146_s20 }
  0x1e   :  { %91 = vrot.lane.b32.xlu0 %v117_v15, %s147_s0 }
  0x74   :  { %v8_v16 = vpop.permute.xlu0 %7   ;;  %v20_v17 = vpop.permute.xlu1 %19  }
  0x75   :  { %10 = vst.msk [vmem:[#allocation0] sm:$0x1] %vm9_vm1, %v8_v16  }
  0x78   :  { %v14_v18 = vpop.permute.xlu0 %13   ;;  %v26_v19 = vpop.permute.xlu1 %25  }
  0x79   :  { %16 = vst.msk [vmem:[#allocation0] sm:$0x1] %vm15_vm2, %v14_v18  }
  0x7a   :  { %22 = vst.msk [vmem:[#allocation0] sm:$0x1] %vm21_vm3, %v20_v17  }
  0x7b   :  { %28 = vst.msk [vmem:[#allocation0] sm:$0x1] %vm27_vm4, %v26_v19  }
  0x7c   :  { %v32_v20 = vpop.permute.xlu0 %31   ;;  %v38_v21 = vpop.permute.xlu1 %37  }
  0x7d   :  { %34 = vst.msk [vmem:[#allocation0] sm:$0x1] %vm33_vm5, %v32_v20  }
  0x7e   :  { %40 = vst.msk [vmem:[#allocation0] sm:$0x1] %vm39_vm6, %v38_v21  }
  0x80   :  { %v44_v22 = vpop.permute.xlu0 %43   ;;  %v50_v23 = vpop.permute.xlu1 %49  }
  0x81   :  { %46 = vst.msk [vmem:[#allocation0] sm:$0x1] %vm45_vm7, %v44_v22  }
  0x82   :  { %52 = vst.msk [vmem:[#allocation0] sm:$0x1] %vm51_vm8, %v50_v23  }
  0x84   :  { %v56_v24 = vpop.permute.xlu0 %55   ;;  %v62_v25 = vpop.permute.xlu1 %61  }
  0x85   :  { %58 = vst.msk [vmem:[#allocation0] sm:$0x1] %vm57_vm9, %v56_v24  }
  0x86   :  { %64 = vst.msk [vmem:[#allocation0] sm:$0x1] %vm63_vm10, %v62_v25  }
  0x88   :  { %v68_v26 = vpop.permute.xlu0 %67   ;;  %v74_v27 = vpop.permute.xlu1 %73  }
  0x89   :  { %70 = vst.msk [vmem:[#allocation0] sm:$0x1] %vm69_vm11, %v68_v26  }
  0x8a   :  { %76 = vst.msk [vmem:[#allocation0] sm:$0x1] %vm75_vm12, %v74_v27  }
  0x8c   :  { %v80_v28 = vpop.permute.xlu0 %79   ;;  %v86_v29 = vpop.permute.xlu1 %85  }
  0x8d   :  { %82 = vst.msk [vmem:[#allocation0] sm:$0x1] %vm81_vm13, %v80_v28  }
  0x8e   :  { %88 = vst.msk [vmem:[#allocation0] sm:$0x1] %vm87_vm14, %v86_v29  }
  0x90   :  { %v92_v30 = vpop.permute.xlu0 %91  }
  0x91   :  { %94 = vst.msk [vmem:[#allocation0] sm:$0x1] %vm93_vm15, %v92_v30  }
  0x98   :  { %v99_v31 = vld [vmem:[#allocation0] sm:$0x1] }
  0x99   :  { %102 = vst [vmem:[%s210_s1] sm:$0x1] %v99_v31 }

// kernel: conv_block_forward.1
= control target key start
LH: loop header
LB: loop body
LE: loop exit
PB: predicated region body
PF: predicated region fallthrough
CT: control target
= control target key end

     0   :  { %s957_s18 = smov 0   ;;  %s1122_s0 = inlined_call_operand.vmem [shape: bf16[2,16,64], index: 0, kind: input, shape index: {}]   ;;  %s1123_s1 = inlined_call_operand.vmem [shape: bf16[192,128], index: 1, kind: input, shape index: {}]   ;;  %s1124_s2 = inlined_call_operand.vmem [shape: f32[1,128], index: 2, kind: input, shape index: {}]   ;;  %s1125_s3 = inlined_call_operand.vmem [shape: bf16[384,128], index: 3, kind: input, shape index: {}]   ;;  %s1126_s4 = inlined_call_operand.vmem [shape: f32[1,128], index: 4, kind: input, shape index: {}]   ;;  %s1127_s5 = inlined_call_operand.vmem [shape: f32[2,16,128], index: 5, kind: output, shape index: {}]  }
   0x1 LB: > { %s762_s19 = sadd.s32 4294967295, %s921_s18   ;;  %p766_p0 = scmp.ge.s32.totalorder %s921_s18, 1  ;;  %s921_s18 = sphi %s957_s18, %s15_s18  }
   0x2   : > { %p187_p1 = scmp.lt.s32.totalorder %s921_s18, 3 }
   0x4   : > { %p188_p2 = pnand %p766_p0, %p187_p1 }
   0x5   : > { %p215_p3 = scmp.lt.s32.totalorder (!%p188_p2), %s762_s19, 1  ;;  %s924_s30 = smov (!%p188_p2), 64  }
   0x6   : > { %191 = sbr.rel (%p188_p2) target bundleno = 575 (0x23f), region = 40 }
   0xb   : > { %v879_v0 = vld [vmem:[%s1123_s1 + $0x38] sm:$0xff]   ;;  %v923_v1 = vmov 0   ;;  %s1133_s19 = smov (!%p215_p3, %s762_s19), 1  ;;  %v880_v2 = vld [vmem:[%s1123_s1 + $0x30] sm:$0xff]   ;;  %v881_v3 = vld [vmem:[%s1123_s1 + $0x28] sm:$0xff]   ;;  %vm248_vm0 = vcmask 1047552  }
   0xc   : > { %365 = vmatprep.subr.bf16.mxu0 %v923_v1  ;;  %s813_s24 = sshll.u32 %s1133_s19, 3  ;;  %v882_v7 = vld [vmem:[%s1123_s1 + $0x20] sm:$0xff]   ;;  %v883_v11 = vld [vmem:[%s1123_s1 + $0x18] sm:$0xff]   ;;  %vm249_vm1 = vsmask.f32 7424  ;;  %vm254_vm2 = vcmask 523264  }
   0xd   : > { %366 = vmatpush1.bf16.msra.mxu0 %v879_v0  ;;  %s219_s27 = scalar_lea.vmem %s1122_s0, %s813_s24  ;;  %v891_v13 = vld [vmem:[%s1125_s3 + $0x78] sm:$0xff]   ;;  %vm993_vm3 = vmand %vm248_vm0, %vm249_vm1  ;;  %v884_v16 = vld [vmem:[%s1123_s1 + $0x10] sm:$0xff]   ;;  %vm241_vm4 = vcmask 1040384   ;;  %vm242_vm5 = vsmask.f32 256  ;;  %v925_v42 = vmov 0.0  }
   0xe   : > { %367 = vmatprep.subr.bf16.mxu0 %v923_v1  ;;  %v878_v4 = vld [vmem:[%s219_s27] sm:$0xff]   ;;  %815 = vmatprep.subr.bf16.mxu1 %v891_v13  ;;  %v892_v17 = vld [vmem:[%s1125_s3 + $0x38] sm:$0xff]   ;;  %v893_v18 = vld [vmem:[%s1125_s3 + $0x70] sm:$0xff]   ;;  %vm926_vm7 = vmmov 0   ;;  %s814_s7 = sshll.u32 %s1133_s19, 4 }
   0xf   : > { %252 = vrot.lane.b32.xlu0 %v878_v4, %s924_s30  ;;  %v234_v5 = vshrl.u32 %v878_v4, 16  ;;  %v237_v6 = vshll.u32 %v878_v4, 16  ;;  %816 = vmatpush3.bf16.msra.mxu1 %v892_v17  ;;  %v894_v19 = vld [vmem:[%s1125_s3 + $0x30] sm:$0xff]   ;;  %v895_v20 = vld [vmem:[%s1125_s3 + $0x68] sm:$0xff]   ;;  %v897_v23 = vld [vmem:[%s1125_s3 + $0x60] sm:$0xff]   ;;  %s224_s10 = scalar_lea.vmem %s1127_s5, %s814_s7 }
  0x10   : > { %817 = vmatprep.subr.bf16.mxu1 %v893_v18  ;;  %v885_v21 = vld [vmem:[%s1123_s1 + $0x8] sm:$0xff]   ;;  %v886_v24 = vld [vmem:[%s1123_s1] sm:$0xff]   ;;  %v887_v26 = vld [vmem:[%s1123_s1 + $0x58] sm:$0xff]  }
  0x11   : > { %368 = vmatpush1.bf16.msra.mxu0 %v880_v2  ;;  %v236_v8 = vrot.slane %v234_v5, 7  ;;  %v245_v9 = vrot.slane %v237_v6, 1  ;;  %v896_v22 = vld [vmem:[%s1125_s3 + $0x28] sm:$0xff]   ;;  %v898_v25 = vld [vmem:[%s1125_s3 + $0x20] sm:$0xff]   ;;  %v888_v27 = vld [vmem:[%s1123_s1 + $0x50] sm:$0xff]  }
  0x12   : > { %369 = vmatprep.subr.bf16.mxu0 %v923_v1  ;;  %v889_v28 = vld [vmem:[%s1123_s1 + $0x48] sm:$0xff]   ;;  %v890_v29 = vld [vmem:[%s1123_s1 + $0x40] sm:$0xff]   ;;  %vm1050_vm6 = vmand %vm241_vm4, %vm242_vm5 }
  0x13   : > { %v239_v10 = vor.u32 %v237_v6, %v236_v8  ;;  %v246_v12 = vor.u32 %v245_v9, %v234_v5  ;;  %818 = vmatpush3.bf16.msra.mxu1 %v894_v19  ;;  %v899_v34 = vld [vmem:[%s1125_s3 + $0x58] sm:$0xff]   ;;  %v901_v36 = vld [vmem:[%s1125_s3 + $0x50] sm:$0xff]   ;;  %v903_v38 = vld [vmem:[%s1125_s3 + $0x48] sm:$0xff]  }
  0x14   : > { %819 = vmatprep.subr.bf16.mxu1 %v895_v20  ;;  %v900_v35 = vld [vmem:[%s1125_s3 + $0x18] sm:$0xff]   ;;  %v902_v37 = vld [vmem:[%s1125_s3 + $0x10] sm:$0xff]   ;;  %v904_v39 = vld [vmem:[%s1125_s3 + $0x8] sm:$0xff]  }
  0x15   : > { %370 = vmatpush1.bf16.msra.mxu0 %v881_v3  ;;  %v251_v15 = vsel %vm993_vm3, %v246_v12, 0  ;;  %v244_v31 = vsel %vm1050_vm6, 0, %v239_v10  ;;  %v905_v40 = vld [vmem:[%s1125_s3 + $0x40] sm:$0xff]   ;;  %v907_v57 = vld [vmem:[%s1125_s3 + $0xb8] sm:$0xff]   ;;  %v908_v59 = vld [vmem:[%s1125_s3 + $0xb0] sm:$0xff]  }
  0x16   : > { %371 = vmatprep.subr.bf16.mxu0 %v923_v1  ;;  %785 = vmatprep.mubr.msk.bf16.mxu0 %vm254_vm2, %v251_v15  ;;  %v906_v41 = vld [vmem:[%s1125_s3] sm:$0xff]   ;;  %v909_v60 = vld [vmem:[%s1125_s3 + $0xa8] sm:$0xff]   ;;  %v911_v62 = vld [vmem:[%s1125_s3 + $0x98] sm:$0xff]  }
  0x17   : > { %820 = vmatpush3.bf16.msra.mxu1 %v896_v22  ;;  %v772_v43 = vld [vmem:[%s1124_s2] ss:$0 sm:$0xff]  ;;  %v912_v63 = vld [vmem:[%s1125_s3 + $0x90] sm:$0xff]   ;;  %v913_v0 = vld [vmem:[%s1125_s3 + $0x88] sm:$0xff]  }
  0x18   : > { %821 = vmatprep.subr.bf16.mxu1 %v897_v23  ;;  %v910_v61 = vld [vmem:[%s1125_s3 + $0xa0] sm:$0xff]  }
  0x19   : > { %372 = vmatpush1.bf16.msra.mxu0 %v882_v7  ;;  %v914_v2 = vld [vmem:[%s1125_s3 + $0x80] sm:$0xff]  }
  0x1a   : > { %373 = vmatprep.subr.bf16.mxu0 %v923_v1  ;;  %v786_v10 = vld [vmem:[%s1126_s4] ss:$0 sm:$0xff] }
  0x1b   : > { %822 = vmatpush3.bf16.msra.mxu1 %v898_v25 }
  0x1c   : > { %823 = vmatprep.subr.bf16.mxu1 %v899_v34 }
  0x1d   : > { %374 = vmatpush1.bf16.msra.mxu0 %v883_v11 }
  0x1e   : > { %375 = vmatprep.subr.bf16.mxu0 %v923_v1 }
  0x1f   : > { %824 = vmatpush3.bf16.msra.mxu1 %v900_v35 }
  0x20   : > { %825 = vmatprep.subr.bf16.mxu1 %v901_v36 }
  0x21   : > { %376 = vmatpush1.bf16.msra.mxu0 %v884_v16 }
  0x22   : > { %377 = vmatprep.subr.bf16.mxu0 %v923_v1 }
  0x23   : > { %826 = vmatpush3.bf16.msra.mxu1 %v902_v37 }
  0x24   : > { %827 = vmatprep.subr.bf16.mxu1 %v903_v38 }
  0x25   : > { %378 = vmatpush1.bf16.msra.mxu0 %v885_v21 }
  0x26   : > { %379 = vmatprep.subr.bf16.mxu0 %v923_v1 }
  0x27   : > { %828 = vmatpush3.bf16.msra.mxu1 %v904_v39 }
  0x28   : > { %829 = vmatprep.subr.bf16.mxu1 %v905_v40 }
  0x29   : > { %380 = vmatpush1.bf16.msra.mxu0 %v886_v24 }
  0x2a   : > { %389 = vmatprep.subr.bf16.mxu0 %v923_v1 }
  0x2b   : > { %830 = vmatpush3.bf16.msra.mxu1 %v906_v41 }
  0x2c   : > { %846 = vmatprep.subr.bf16.mxu1 %v925_v42 }
  0x2d   : > { %390 = vmatpush2.bf16.msra.mxu0 %v887_v26 }
  0x2e   : > { %391 = vmatprep.subr.bf16.mxu0 %v923_v1 }
  0x31   : > { %392 = vmatpush2.bf16.msra.mxu0 %v888_v27 }
  0x32   : > { %393 = vmatprep.subr.bf16.mxu0 %v923_v1 }
  0x35   : > { %394 = vmatpush2.bf16.msra.mxu0 %v889_v28 }
  0x36   : > { %395 = vmatprep.subr.bf16.mxu0 %v923_v1 }
  0x39   : > { %396 = vmatpush2.bf16.msra.mxu0 %v890_v29 }
  0x81   : > { %v253_v32 = vpop.permute.xlu0 %252 }
  0x82   : > { %v257_v33 = vsel %vm254_vm2, %v244_v31, %v253_v32 }
  0x83   : > { %398 = vmatmul.mubr.bf16.vlgmr.msra.gmra.mxu0 %v257_v33 }
 0x143   : > { %v399_v44 = vpop.f32.mrf.mxu0 }
 0x144   : > { %v400_v46 = vadd.f32 %v772_v43, %v399_v44 }
 0x145   : > { %v401_v45 = vpop.f32.mrf.mxu0 }
 0x146   : > { %v406_v50 = vmax.f32 %v400_v46, 0.0 }
 0x147   : > { %v402_v47 = vpop.f32.mrf.mxu0 }
 0x148   : > { %v403_v48 = vadd.f32 %v772_v43, %v402_v47 }
 0x149   : > { %v404_v49 = vpop.f32.mrf.mxu0 }
 0x14a   : > { %v407_v51 = vmax.f32 %v403_v48, 0.0 }
 0x14c   : > { %v408_v52 = vpack.c.bf16 %v407_v51, %v406_v50 }
 0x14e   : > { %v410_v53 = vshrl.u32 %v408_v52, 16  ;;  %653 = vmatprep.mubr.bf16.mxu1 %v408_v52  ;;  %v413_v55 = vshll.u32 %v408_v52, 16 }
 0x150   : > { %v412_v54 = vrot.slane %v410_v53, 7  ;;  %v418_v1 = vrot.slane %v413_v55, 1 }
 0x152   : > { %v415_v56 = vor.u32 %v413_v55, %v412_v54  ;;  %v419_v3 = vor.u32 %v418_v1, %v410_v53 }
 0x154   : > { %v417_v58 = vsel %vm1050_vm6, 0, %v415_v56  ;;  %v421_v4 = vsel %vm993_vm3, %v419_v3, 0 }
 0x155   : > { %654 = vmatmul.mubr.bf16.vlgmr.msra.gmra.mxu1 %v417_v58 }
 0x156   : > { %847 = vmatpush3.bf16.msra.mxu1 %v907_v57  ;;  %862 = vmatprep.mubr.msk.bf16.mxu1 %vm926_vm7, %v925_v42 }
 0x157   : > { %848 = vmatprep.subr.bf16.mxu1 %v925_v42 }
 0x15a   : > { %849 = vmatpush3.bf16.msra.mxu1 %v908_v59 }
 0x15b   : > { %850 = vmatprep.subr.bf16.mxu1 %v925_v42 }
 0x15e   : > { %851 = vmatpush3.bf16.msra.mxu1 %v909_v60 }
 0x15f   : > { %852 = vmatprep.subr.bf16.mxu1 %v925_v42 }
 0x162   : > { %853 = vmatpush3.bf16.msra.mxu1 %v910_v61 }
 0x163   : > { %854 = vmatprep.subr.bf16.mxu1 %v925_v42 }
 0x166   : > { %855 = vmatpush3.bf16.msra.mxu1 %v911_v62 }
 0x167   : > { %856 = vmatprep.subr.bf16.mxu1 %v925_v42 }
 0x16a   : > { %857 = vmatpush3.bf16.msra.mxu1 %v912_v63 }
 0x16b   : > { %858 = vmatprep.subr.bf16.mxu1 %v925_v42 }
 0x16e   : > { %859 = vmatpush3.bf16.msra.mxu1 %v913_v0 }
 0x16f   : > { %860 = vmatprep.subr.bf16.mxu1 %v925_v42 }
 0x172   : > { %861 = vmatpush3.bf16.msra.mxu1 %v914_v2 }
 0x175   : > { %863 = vmatmul.mubr.bf16.vlgmr.msra.gmra.mxu1 %v421_v4 }
 0x215   : > { %v831_v5 = vpop.f32.mrf.mxu1 }
 0x217   : > { %v832_v6 = vpop.f32.mrf.mxu1 }
 0x218   : > { %v833_v8 = vadd.f32 %v832_v6, %v831_v5 }
 0x219   : > { %v834_v7 = vpop.f32.mrf.mxu1 }
 0x21a   : > { %v656_v12 = vadd.f32 %v833_v8, %v786_v10 }
 0x21b   : > { %v835_v9 = vpop.f32.mrf.mxu1 }
 0x21c   : > { %v836_v11 = vadd.f32 %v835_v9, %v834_v7 }
 0x21e   : > { %v659_v17 = vadd.f32 %v836_v11, %v786_v10 }
 0x235   : > { %v696_v13 = vpop.f32.mrf.mxu1 }
 0x236   : > { %v697_v15 = vadd.f32 %v696_v13, %v656_v12 }
 0x237   : > { %v864_v14 = vpop.f32.mrf.mxu1 }
 0x238   : > { %v703_v16 = vmax.f32 %v697_v15, 0.0 }
 0x239   : > { %v699_v18 = vpop.f32.mrf.mxu1 }
 0x23a   : > { %705 = vst [vmem:[%s224_s10] sm:$0xff] %v703_v16  ;;  %v700_v19 = vadd.f32 %v699_v18, %v659_v17 }
 0x23b   : > { %v865_v20 = vpop.f32.mrf.mxu1 }
 0x23c   : > { %v704_v21 = vmax.f32 %v700_v19, 0.0 }
 0x23e   : > { %706 = vst [vmem:[%s224_s10 + $0x8] sm:$0xff] %v704_v21 }
 0x23f PF: > { %s15_s18 = sadd.s32 1, %s921_s18  }
 0x240   : > { %p12_p4 = scmp.ge.s32.totalorder %s15_s18, 4  }
 0x242   :  { %14 = sbr.rel (!%p12_p4) target bundleno = 1 (0x1), region = 70 }

</bundles_post_ra>
